<compile_context>
chip_gen: v5e
topology: v5e:2x2
jax: 0.10.0
libtpu: 0.0.40
codegen_flags: <defaults>
</compile_context>

<pallas_src>
import functools

import jax
import jax.numpy as jnp
import numpy as np
from jax.experimental import pallas as pl
from jax.experimental.pallas import tpu as pltpu

_NEG_LARGE = -1e30  # finite "minus infinity" for masked scores / running-max init


def _round_up(x, m):
    return (x + m - 1) // m * m


def _hw_config():
    """Per-generation defaults: (compute_dtype, block_q, block_k, vmem_clamp_bytes)."""
    try:
        on_tpu = jax.default_backend() == "tpu"
        kind = jax.devices()[0].device_kind.lower() if on_tpu else ""
    except Exception:  # pragma: no cover - defensive
        on_tpu, kind = False, ""
    if not on_tpu:
        # CPU / interpret fallback: XLA:CPU's DotThunk does not support
        # bf16 x bf16 -> f32 dots, so stay in f32 there. Real TPUs below take
        # the bf16 MXU fast path (f32 stats/accumulation keep accuracy).
        return jnp.float32, 512, 256, 64 * 1024 * 1024
    if "v7" in kind or "7x" in kind:
        # 64 MiB physical VMEM per TC: keep the scoped limit <= 48 MiB and a
        # moderate kv tile. (Weights could also be single-buffered via
        # pipeline_mode=pl.Buffered(1) at very large C.)
        return jnp.bfloat16, 512, 256, 48 * 1024 * 1024
    # v5e / v6e: 128 MiB physical VMEM -> big tiles, ~100 MiB scoped limit.
    return jnp.bfloat16, 512, 512, 100 * 1024 * 1024


def _conv_self_attn_kernel(x_q_ref, k_ref, v_ref, wq_ref, wo_ref, gamma_ref,
                           o_ref, q_ref, acc_ref, m_ref, l_ref,
                           *, n_valid, needs_mask, compute_dtype):
    ik = pl.program_id(2)
    cdt = compute_dtype

    @pl.when(ik == 0)
    def _init():
        m_ref[...] = jnp.full(m_ref.shape, _NEG_LARGE, m_ref.dtype)
        l_ref[...] = jnp.zeros(l_ref.shape, l_ref.dtype)
        acc_ref[...] = jnp.zeros(acc_ref.shape, acc_ref.dtype)
        # Q projection (K=C matmul) cached once per (b, iq) kv sweep.
        q_ref[...] = jnp.dot(wq_ref[...], x_q_ref[0].astype(cdt),
                             preferred_element_type=jnp.float32).astype(cdt)

    k = k_ref[0]      # (Hc, tk) compute dtype (hoisted projection)
    v = v_ref[0]      # (Cv, tk)
    q = q_ref[...]    # (Hc, tq)

    # s[j, i] = <k_j, q_i>: contract the Hc (sublane) axis directly so the
    # operand transpose folds into the MXU feed -- no lane-sparse (tk, Hc)
    # tile, no extra full-tile cast.
    s = jax.lax.dot_general(k, q, (((0,), (0,)), ((), ())),
                            preferred_element_type=jnp.float32)      # (tk, tq) f32

    if needs_mask:
        # Padding only exists on the kv axis; a (tk, 1) additive bias costs one
        # VPU add per element instead of a compare+select over the whole tile.
        tk_tile = s.shape[0]
        kv_idx = jax.lax.broadcasted_iota(jnp.int32, (tk_tile, 1), 0) + ik * tk_tile
        bias = jnp.where(kv_idx < n_valid, 0.0, _NEG_LARGE)
        s = s + bias

    # Online softmax: reductions over the kv sublane axis give (1, tq) stats
    # that broadcast cheaply over the lane-dense accumulator.
    m_prev = m_ref[...]                                              # (1, tq)
    m_new = jnp.maximum(m_prev, jnp.max(s, axis=0, keepdims=True))
    alpha = jnp.exp(m_prev - m_new)                                  # (1, tq)
    p = jnp.exp(s - m_new)                                           # (tk, tq) f32
    l_ref[...] = alpha * l_ref[...] + jnp.sum(p, axis=0, keepdims=True)
    acc_ref[...] = alpha * acc_ref[...] + jnp.dot(
        v, p.astype(cdt), preferred_element_type=jnp.float32)        # (Cv, tq)
    m_ref[...] = m_new

    @pl.when(ik == pl.num_programs(2) - 1)
    def _finalize():
        # Normalization folded into the epilogue: O(tq) work, not O(N^2).
        y = acc_ref[...] * pl.reciprocal(l_ref[...], approx=False)   # (Cv, tq) f32
        out = jnp.dot(wo_ref[...], y.astype(cdt),
                      preferred_element_type=jnp.float32)            # (C, tq) f32
        gamma = gamma_ref[0, 0]
        # Residual uses x in its ORIGINAL dtype (full-precision residual add).
        o_ref[0] = (out * gamma + x_q_ref[0].astype(jnp.float32)).astype(o_ref.dtype)


def conv_self_attention(x_nchw, w_attn_conv, w_out_conv, gamma, *,
                        block_q=None, block_k=None, compute_dtype=None):
    """x_nchw: (B, C, W, H); w_attn_conv: (2*Hc + C//2, C, 1, 1);
    w_out_conv: (C, C//2, 1, 1); gamma: (1,). Returns (B, C, W, H)."""
    B, C, W, H = x_nchw.shape
    assert C % 8 == 0, "in_channels must be a multiple of 8"
    Hc = C // 8
    Cv = C // 2
    N = W * H
    out_dtype = x_nchw.dtype

    cfg_dtype, cfg_bq, cfg_bk, vmem_clamp = _hw_config()
    if compute_dtype is None:
        compute_dtype = cfg_dtype
    if block_q is None:
        block_q = cfg_bq
    if block_k is None:
        block_k = cfg_bk

    # Lane-multiple tiles, capped at the (padded) spatial extent.
    n128 = _round_up(N, 128)
    block_q = min(_round_up(max(block_q, 128), 128), n128)
    block_k = min(_round_up(max(block_k, 128), 128), n128)
    # Megacore / v7x: keep the parallel extent B * n_q >= 2 where possible so
    # both TensorCores get work on small-batch shapes.
    if B * (-(-N // block_q)) < 2 and N > 128:
        block_q = min(block_q, _round_up(-(-N // 2), 128))

    Np_q = _round_up(N, block_q)        # query-side padding
    Np_k = _round_up(N, block_k)        # kv-side padding
    needs_mask = Np_k != N
    n_q = Np_q // block_q
    n_k = Np_k // block_k

    # NCHW-native layout: a reshape (plus lane padding if ragged), no transposes.
    x = x_nchw.reshape(B, C, N)
    x_q_in = x if Np_q == N else jnp.pad(x, ((0, 0), (0, 0), (0, Np_q - N)))
    x_kv = x if Np_k == N else jnp.pad(x, ((0, 0), (0, 0), (0, Np_k - N)))

    wa = w_attn_conv[:, :, 0, 0]                            # (2*Hc + Cv, C)
    wq = wa[:Hc].astype(compute_dtype)                      # (Hc, C)
    wk = wa[Hc:2 * Hc]                                      # (Hc, C)
    wv = wa[2 * Hc:]                                        # (Cv, C)
    wo = w_out_conv[:, :, 0, 0].astype(compute_dtype)       # (C, Cv)
    gamma2 = gamma.reshape(1, 1).astype(jnp.float32)

    # Hoisted K/V projections: one XLA matmul per batch, done once, instead of
    # re-projecting the kv tile on every (iq, ik) grid point.
    k_all = jnp.einsum('hc,bcn->bhn', wk, x_kv,
                       preferred_element_type=jnp.float32).astype(compute_dtype)
    v_all = jnp.einsum('vc,bcn->bvn', wv, x_kv,
                       preferred_element_type=jnp.float32).astype(compute_dtype)

    # Scoped-VMEM budget: double-buffered tiles + scratch + score temporaries,
    # with headroom; clamped per-generation (<=48 MiB on v7x, ~100 MiB v5e/v6e).
    xb = jnp.dtype(x_nchw.dtype).itemsize
    cb = jnp.dtype(compute_dtype).itemsize
    ob = jnp.dtype(out_dtype).itemsize
    est = (2 * C * block_q * xb                      # x q tile, double buffered
           + 2 * (Hc + Cv) * block_k * cb            # k + v tiles, double buffered
           + 2 * C * block_q * ob                    # output tile, double buffered
           + 2 * (Hc * C + C * Cv) * cb              # resident weights (2x buffered)
           + (Hc * cb + (Cv + 2) * 4) * block_q      # q / acc / m / l scratch
           + 6 * block_k * block_q * 4)              # s / p temporaries + headroom
    vmem_limit = int(min(max(2 * est, 32 * 1024 * 1024), vmem_clamp))

    kernel = functools.partial(_conv_self_attn_kernel, n_valid=N,
                               needs_mask=needs_mask, compute_dtype=compute_dtype)

    out = pl.pallas_call(
        kernel,
        out_shape=jax.ShapeDtypeStruct((B, C, Np_q), out_dtype),
        grid=(B, n_q, n_k),
        in_specs=[
            pl.BlockSpec((1, C, block_q), lambda b, iq, ik: (b, 0, iq)),   # x (q tile + residual)
            pl.BlockSpec((1, Hc, block_k), lambda b, iq, ik: (b, 0, ik)),  # k (hoisted proj)
            pl.BlockSpec((1, Cv, block_k), lambda b, iq, ik: (b, 0, ik)),  # v (hoisted proj)
            pl.BlockSpec((Hc, C), lambda b, iq, ik: (0, 0)),               # wq (resident)
            pl.BlockSpec((C, Cv), lambda b, iq, ik: (0, 0)),               # wo (resident)
            pl.BlockSpec((1, 1), lambda b, iq, ik: (0, 0),
                         memory_space=pltpu.MemorySpace.SMEM),             # gamma
        ],
        out_specs=pl.BlockSpec((1, C, block_q), lambda b, iq, ik: (b, 0, iq)),
        scratch_shapes=[
            pltpu.VMEM((Hc, block_q), compute_dtype),   # cached Q projection
            pltpu.VMEM((Cv, block_q), jnp.float32),     # acc (unnormalized output)
            pltpu.VMEM((1, block_q), jnp.float32),      # running max m
            pltpu.VMEM((1, block_q), jnp.float32),      # running denom l
        ],
        compiler_params=pltpu.CompilerParams(
            dimension_semantics=("parallel", "parallel", "arbitrary"),
            vmem_limit_bytes=vmem_limit),
    )(x_q_in, k_all, v_all, wq, wo, gamma2)

    if Np_q != N:
        out = out[:, :, :N]
    return out.reshape(B, C, W, H)


def _reference(x_nchw, w_attn_conv, w_out_conv, gamma):
    """Pure-JAX transcription of the PyTorch forward (downsample=False)."""
    B, C, W, H = x_nchw.shape
    h = C // 8
    wa = w_attn_conv[:, :, 0, 0]                                    # (P, C)
    weights = jnp.einsum('oc,bcwh->bowh', wa, x_nchw)
    query = weights[:, :h].reshape(B, h, W * H)
    key = weights[:, h:2 * h].reshape(B, h, -1)
    value = weights[:, 2 * h:].reshape(B, C // 2, -1)
    s = jnp.einsum('bhi,bhj->bij', query, key)
    logsum = jax.scipy.special.logsumexp(s, axis=2, keepdims=True)
    attn = jnp.exp(s - logsum)
    y = jnp.einsum('bcj,bij->bci', value, attn).reshape(B, C // 2, W, H)
    wo = w_out_conv[:, :, 0, 0]                                     # (C, C//2)
    return jnp.einsum('oc,bcwh->bowh', wo, y) * gamma.reshape(()) + x_nchw


if __name__ == "__main__":
    key = jax.random.PRNGKey(0)

    def make_inputs(k, B, C, W, H):
        kx, kwa, kwo = jax.random.split(k, 3)
        P = 2 * (C // 8) + C // 2
        x = jax.random.normal(kx, (B, C, W, H), dtype=jnp.float32)
        w_attn = 0.1 * jax.random.normal(kwa, (P, C, 1, 1), dtype=jnp.float32)
        w_out = 0.1 * jax.random.normal(kwo, (C, C // 2, 1, 1), dtype=jnp.float32)
        # nn.Parameter(torch.zeros(1)) would make the forward an identity; use a
        # non-zero gamma so the whole path is exercised.
        g = jnp.array([0.5], dtype=jnp.float32)
        return x, w_attn, w_out, g

    # Case 1: C=16, 16x16 map -> N=256 with 128-wide tiles: 2 query tiles x 2 kv
    # tiles, exercising the online-softmax accumulation and the cached-Q path.
    x, wa, wo_w, g = make_inputs(key, 2, 16, 16, 16)
    ref = _reference(x, wa, wo_w, g)
    out = jax.block_until_ready(conv_self_attention(
        x, wa, wo_w, g, block_q=128, block_k=128, compute_dtype=jnp.float32))
    np.testing.assert_allclose(np.asarray(out), np.asarray(ref), rtol=1e-4, atol=1e-4)

    # Case 2: ragged N (11*9 = 99, not a multiple of 128) -> padded kv with the
    # (tk, 1) additive-bias mask path.
    x2, wa2, wo2, g2 = make_inputs(jax.random.fold_in(key, 1), 2, 32, 11, 9)
    out2 = jax.block_until_ready(conv_self_attention(
        x2, wa2, wo2, g2, compute_dtype=jnp.float32))
    ref2 = _reference(x2, wa2, wo2, g2)
    np.testing.assert_allclose(np.asarray(out2), np.asarray(ref2), rtol=1e-4, atol=1e-4)

    # Case 3: auto compute dtype -- bf16 MXU fast path on real TPUs (f32 stats /
    # accumulation), f32 fallback elsewhere (bf16 x bf16 -> f32 dots unsupported
    # off-TPU). Tolerance tracks the dtype actually selected.
    auto_dtype, _, _, _ = _hw_config()
    out3 = jax.block_until_ready(conv_self_attention(
        x, wa, wo_w, g, block_q=128, block_k=128))
    tol = 3e-2 if auto_dtype == jnp.bfloat16 else 1e-4
    np.testing.assert_allclose(np.asarray(out3), np.asarray(ref), rtol=tol, atol=tol)

    print("KERNEL_OK")
</pallas_src>

<mosaic_0001>
module attributes {stable_mosaic.version = 11 : i64} {
  func.func @_conv_self_attn_kernel(%arg0: i32, %arg1: i32, %arg2: i32, %arg3: memref<1x16x128xf32, #tpu.memory_space<vmem>>, %arg4: memref<1x2x128xf32, #tpu.memory_space<vmem>>, %arg5: memref<1x8x128xf32, #tpu.memory_space<vmem>>, %arg6: memref<2x16xf32, #tpu.memory_space<vmem>>, %arg7: memref<16x8xf32, #tpu.memory_space<vmem>>, %arg8: memref<1x1xf32, #tpu.memory_space<smem>>, %arg9: memref<1x16x128xf32, #tpu.memory_space<vmem>>, %arg10: memref<2x128xf32, #tpu.memory_space<vmem>>, %arg11: memref<8x128xf32, #tpu.memory_space<vmem>>, %arg12: memref<1x128xf32, #tpu.memory_space<vmem>>, %arg13: memref<1x128xf32, #tpu.memory_space<vmem>>) attributes {dimension_semantics = [#tpu.dimension_semantics<parallel>, #tpu.dimension_semantics<parallel>, #tpu.dimension_semantics<arbitrary>], iteration_bounds = array<i64: 2, 2, 2>, scalar_prefetch = 0 : i64, scratch_operands = 4 : i64, tpu.core_type = #tpu.core_type<tc>, window_params = [{transform_indices = @transform_0, window_bounds = array<i64: 1, 16, 128>}, {transform_indices = @transform_1, window_bounds = array<i64: 1, 2, 128>}, {transform_indices = @transform_2, window_bounds = array<i64: 1, 8, 128>}, {pipeline_mode = #tpu.pipeline_mode<synchronous>, transform_indices = @transform_3, window_bounds = array<i64: 2, 16>}, {pipeline_mode = #tpu.pipeline_mode<synchronous>, transform_indices = @transform_4, window_bounds = array<i64: 16, 8>}, {transform_indices = @transform_5, window_bounds = array<i64: 1, 1>}, {transform_indices = @transform_6, window_bounds = array<i64: 1, 16, 128>}]} {
    %c0_i32 = arith.constant 0 : i32
    %0 = arith.cmpi eq, %arg2, %c0_i32 : i32
    %1 = arith.extui %0 : i1 to i32
    %c0_i32_0 = arith.constant 0 : i32
    %2 = arith.cmpi ne, %1, %c0_i32_0 : i32
    scf.if %2 {
      %cst_24 = arith.constant -1.000000e+30 : f32
      %34 = vector.broadcast %cst_24 : f32 to vector<1x128xf32>
      %c0_25 = arith.constant 0 : index
      %c0_26 = arith.constant 0 : index
      %35 = vector.load %arg12[%c0_25, %c0_26] : memref<1x128xf32, #tpu.memory_space<vmem>>, vector<1x128xf32>
      tpu.vector_store %arg12[%c0_25, %c0_26], %34 {strides = array<i32>} : memref<1x128xf32, #tpu.memory_space<vmem>>, vector<1x128xf32>,
      %cst_27 = arith.constant 0.000000e+00 : f32
      %36 = vector.broadcast %cst_27 : f32 to vector<1x128xf32>
      %c0_28 = arith.constant 0 : index
      %c0_29 = arith.constant 0 : index
      %37 = vector.load %arg13[%c0_28, %c0_29] : memref<1x128xf32, #tpu.memory_space<vmem>>, vector<1x128xf32>
      tpu.vector_store %arg13[%c0_28, %c0_29], %36 {strides = array<i32>} : memref<1x128xf32, #tpu.memory_space<vmem>>, vector<1x128xf32>,
      %cst_30 = arith.constant 0.000000e+00 : f32
      %38 = vector.broadcast %cst_30 : f32 to vector<8x128xf32>
      %c0_31 = arith.constant 0 : index
      %c0_32 = arith.constant 0 : index
      %39 = vector.load %arg11[%c0_31, %c0_32] : memref<8x128xf32, #tpu.memory_space<vmem>>, vector<8x128xf32>
      tpu.vector_store %arg11[%c0_31, %c0_32], %38 {strides = array<i32>} : memref<8x128xf32, #tpu.memory_space<vmem>>, vector<8x128xf32>,
      %c0_33 = arith.constant 0 : index
      %c0_34 = arith.constant 0 : index
      %40 = vector.load %arg6[%c0_33, %c0_34] : memref<2x16xf32, #tpu.memory_space<vmem>>, vector<2x16xf32>
      %c0_35 = arith.constant 0 : index
      %c0_36 = arith.constant 0 : index
      %c0_37 = arith.constant 0 : index
      %41 = vector.load %arg3[%c0_35, %c0_36, %c0_37] : memref<1x16x128xf32, #tpu.memory_space<vmem>>, vector<1x16x128xf32>
      %42 = vector.shape_cast %41 : vector<1x16x128xf32> to vector<16x128xf32>
      %cst_38 = arith.constant dense<0.000000e+00> : vector<2x128xf32>
      %43 = tpu.matmul %40, %42, %cst_38 {dimension_numbers = #tpu.dot_dimension_numbers<[1], [0], [0], [1], [0, 0, 1, 1], [], []>} : vector<2x16xf32>, vector<16x128xf32>, vector<2x128xf32> -> vector<2x128xf32>
      %c0_39 = arith.constant 0 : index
      %c0_40 = arith.constant 0 : index
      %44 = vector.load %arg10[%c0_39, %c0_40] : memref<2x128xf32, #tpu.memory_space<vmem>>, vector<2x128xf32>
      tpu.vector_store %arg10[%c0_39, %c0_40], %43 {strides = array<i32>} : memref<2x128xf32, #tpu.memory_space<vmem>>, vector<2x128xf32>,
    } else {
    }
    %c0 = arith.constant 0 : index
    %c0_1 = arith.constant 0 : index
    %c0_2 = arith.constant 0 : index
    %3 = vector.load %arg4[%c0, %c0_1, %c0_2] : memref<1x2x128xf32, #tpu.memory_space<vmem>>, vector<1x2x128xf32>
    %4 = vector.shape_cast %3 : vector<1x2x128xf32> to vector<2x128xf32>
    %c0_3 = arith.constant 0 : index
    %c0_4 = arith.constant 0 : index
    %c0_5 = arith.constant 0 : index
    %5 = vector.load %arg5[%c0_3, %c0_4, %c0_5] : memref<1x8x128xf32, #tpu.memory_space<vmem>>, vector<1x8x128xf32>
    %6 = vector.shape_cast %5 : vector<1x8x128xf32> to vector<8x128xf32>
    %c0_6 = arith.constant 0 : index
    %c0_7 = arith.constant 0 : index
    %7 = vector.load %arg10[%c0_6, %c0_7] : memref<2x128xf32, #tpu.memory_space<vmem>>, vector<2x128xf32>
    %cst = arith.constant dense<0.000000e+00> : vector<128x128xf32>
    %8 = tpu.matmul %4, %7, %cst {dimension_numbers = #tpu.dot_dimension_numbers<[0], [0], [1], [1], [0, 1, 1, 1], [], []>} : vector<2x128xf32>, vector<2x128xf32>, vector<128x128xf32> -> vector<128x128xf32>
    %c0_8 = arith.constant 0 : index
    %c0_9 = arith.constant 0 : index
    %9 = vector.load %arg12[%c0_8, %c0_9] : memref<1x128xf32, #tpu.memory_space<vmem>>, vector<1x128xf32>
    %cst_10 = arith.constant dense<0xFF800000> : vector<128xf32>
    %10 = vector.multi_reduction <maximumf>, %8, %cst_10 [0] : vector<128x128xf32> to vector<128xf32>
    %11 = vector.shape_cast %10 : vector<128xf32> to vector<1x128xf32>
    %12 = arith.maximumf %9, %11 : vector<1x128xf32>
    %13 = arith.subf %9, %12 : vector<1x128xf32>
    %14 = math.exp %13 : vector<1x128xf32>
    %15 = vector.broadcast %12 : vector<1x128xf32> to vector<128x128xf32>
    %16 = arith.subf %8, %15 : vector<128x128xf32>
    %17 = math.exp %16 : vector<128x128xf32>
    %c0_11 = arith.constant 0 : index
    %c0_12 = arith.constant 0 : index
    %18 = vector.load %arg13[%c0_11, %c0_12] : memref<1x128xf32, #tpu.memory_space<vmem>>, vector<1x128xf32>
    %19 = arith.mulf %14, %18 : vector<1x128xf32>
    %cst_13 = arith.constant dense<0.000000e+00> : vector<128xf32>
    %20 = vector.multi_reduction <add>, %17, %cst_13 [0] : vector<128x128xf32> to vector<128xf32>
    %21 = vector.shape_cast %20 : vector<128xf32> to vector<1x128xf32>
    %22 = arith.addf %19, %21 : vector<1x128xf32>
    %c0_14 = arith.constant 0 : index
    %c0_15 = arith.constant 0 : index
    %23 = vector.load %arg13[%c0_14, %c0_15] : memref<1x128xf32, #tpu.memory_space<vmem>>, vector<1x128xf32>
    tpu.vector_store %arg13[%c0_14, %c0_15], %22 {strides = array<i32>} : memref<1x128xf32, #tpu.memory_space<vmem>>, vector<1x128xf32>,
    %c0_16 = arith.constant 0 : index
    %c0_17 = arith.constant 0 : index
    %24 = vector.load %arg11[%c0_16, %c0_17] : memref<8x128xf32, #tpu.memory_space<vmem>>, vector<8x128xf32>
    %25 = vector.broadcast %14 : vector<1x128xf32> to vector<8x128xf32>
    %26 = arith.mulf %25, %24 : vector<8x128xf32>
    %cst_18 = arith.constant dense<0.000000e+00> : vector<8x128xf32>
    %27 = tpu.matmul %6, %17, %cst_18 {dimension_numbers = #tpu.dot_dimension_numbers<[1], [0], [0], [1], [0, 0, 1, 1], [], []>} : vector<8x128xf32>, vector<128x128xf32>, vector<8x128xf32> -> vector<8x128xf32>
    %28 = arith.addf %26, %27 : vector<8x128xf32>
    %c0_19 = arith.constant 0 : index
    %c0_20 = arith.constant 0 : index
    %29 = vector.load %arg11[%c0_19, %c0_20] : memref<8x128xf32, #tpu.memory_space<vmem>>, vector<8x128xf32>
    tpu.vector_store %arg11[%c0_19, %c0_20], %28 {strides = array<i32>} : memref<8x128xf32, #tpu.memory_space<vmem>>, vector<8x128xf32>,
    %c0_21 = arith.constant 0 : index
    %c0_22 = arith.constant 0 : index
    %30 = vector.load %arg12[%c0_21, %c0_22] : memref<1x128xf32, #tpu.memory_space<vmem>>, vector<1x128xf32>
    tpu.vector_store %arg12[%c0_21, %c0_22], %12 {strides = array<i32>} : memref<1x128xf32, #tpu.memory_space<vmem>>, vector<1x128xf32>,
    %c1_i32 = arith.constant 1 : i32
    %31 = arith.cmpi eq, %arg2, %c1_i32 : i32
    %32 = arith.extui %31 : i1 to i32
    %c0_i32_23 = arith.constant 0 : i32
    %33 = arith.cmpi ne, %32, %c0_i32_23 : i32
    scf.if %33 {
      %c0_24 = arith.constant 0 : index
      %c0_25 = arith.constant 0 : index
      %34 = vector.load %arg11[%c0_24, %c0_25] : memref<8x128xf32, #tpu.memory_space<vmem>>, vector<8x128xf32>
      %c0_26 = arith.constant 0 : index
      %c0_27 = arith.constant 0 : index
      %35 = vector.load %arg13[%c0_26, %c0_27] : memref<1x128xf32, #tpu.memory_space<vmem>>, vector<1x128xf32>
      %36 = tpu.reciprocal %35 : vector<1x128xf32> -> vector<1x128xf32>
      %37 = vector.broadcast %36 : vector<1x128xf32> to vector<8x128xf32>
      %38 = arith.mulf %34, %37 : vector<8x128xf32>
      %c0_28 = arith.constant 0 : index
      %c0_29 = arith.constant 0 : index
      %39 = vector.load %arg7[%c0_28, %c0_29] : memref<16x8xf32, #tpu.memory_space<vmem>>, vector<16x8xf32>
      %cst_30 = arith.constant dense<0.000000e+00> : vector<16x128xf32>
      %40 = tpu.matmul %39, %38, %cst_30 {dimension_numbers = #tpu.dot_dimension_numbers<[1], [0], [0], [1], [0, 0, 1, 1], [], []>} : vector<16x8xf32>, vector<8x128xf32>, vector<16x128xf32> -> vector<16x128xf32>
      %c0_31 = arith.constant 0 : index
      %c0_32 = arith.constant 0 : index
      %41 = memref.load %arg8[%c0_31, %c0_32] : memref<1x1xf32, #tpu.memory_space<smem>>
      %42 = vector.broadcast %41 : f32 to vector<16x128xf32>
      %43 = arith.mulf %40, %42 : vector<16x128xf32>
      %c0_33 = arith.constant 0 : index
      %c0_34 = arith.constant 0 : index
      %c0_35 = arith.constant 0 : index
      %44 = vector.load %arg3[%c0_33, %c0_34, %c0_35] : memref<1x16x128xf32, #tpu.memory_space<vmem>>, vector<1x16x128xf32>
      %45 = vector.shape_cast %44 : vector<1x16x128xf32> to vector<16x128xf32>
      %46 = arith.addf %43, %45 : vector<16x128xf32>
      %c0_36 = arith.constant 0 : index
      %c0_37 = arith.constant 0 : index
      %c0_38 = arith.constant 0 : index
      %47 = vector.load %arg9[%c0_36, %c0_37, %c0_38] : memref<1x16x128xf32, #tpu.memory_space<vmem>>, vector<1x16x128xf32>
      %48 = vector.shape_cast %47 : vector<1x16x128xf32> to vector<16x128xf32>
      %49 = vector.shape_cast %46 : vector<16x128xf32> to vector<1x16x128xf32>
      tpu.vector_store %arg9[%c0_36, %c0_37, %c0_38], %49 {strides = array<i32>} : memref<1x16x128xf32, #tpu.memory_space<vmem>>, vector<1x16x128xf32>,
    } else {
    }
    return
  }
  func.func @transform_0(%arg0: i32, %arg1: i32, %arg2: i32) -> (i32, i32, i32) {
    %c0_i32 = arith.constant 0 : i32
    %c0_i32_0 = arith.constant 0 : i32
    return %arg0, %c0_i32, %arg1 : i32, i32, i32
  }
  func.func @transform_1(%arg0: i32, %arg1: i32, %arg2: i32) -> (i32, i32, i32) {
    %c0_i32 = arith.constant 0 : i32
    %c0_i32_0 = arith.constant 0 : i32
    return %arg0, %c0_i32, %arg2 : i32, i32, i32
  }
  func.func @transform_2(%arg0: i32, %arg1: i32, %arg2: i32) -> (i32, i32, i32) {
    %c0_i32 = arith.constant 0 : i32
    %c0_i32_0 = arith.constant 0 : i32
    return %arg0, %c0_i32, %arg2 : i32, i32, i32
  }
  func.func @transform_3(%arg0: i32, %arg1: i32, %arg2: i32) -> (i32, i32) {
    %c0_i32 = arith.constant 0 : i32
    %c0_i32_0 = arith.constant 0 : i32
    %c0_i32_1 = arith.constant 0 : i32
    return %c0_i32, %c0_i32_0 : i32, i32
  }
  func.func @transform_4(%arg0: i32, %arg1: i32, %arg2: i32) -> (i32, i32) {
    %c0_i32 = arith.constant 0 : i32
    %c0_i32_0 = arith.constant 0 : i32
    %c0_i32_1 = arith.constant 0 : i32
    return %c0_i32, %c0_i32_0 : i32, i32
  }
  func.func @transform_5(%arg0: i32, %arg1: i32, %arg2: i32) -> (i32, i32) {
    %c0_i32 = arith.constant 0 : i32
    %c0_i32_0 = arith.constant 0 : i32
    %c0_i32_1 = arith.constant 0 : i32
    return %c0_i32, %c0_i32_0 : i32, i32
  }
  func.func @transform_6(%arg0: i32, %arg1: i32, %arg2: i32) -> (i32, i32, i32) {
    %c0_i32 = arith.constant 0 : i32
    %c0_i32_0 = arith.constant 0 : i32
    return %arg0, %c0_i32, %arg1 : i32, i32, i32
  }
}

</mosaic_0001>

<bundles_post_ra>
// kernel: tpu_custom_call.1
= control target key start
LH: loop header
LB: loop body
LE: loop exit
PB: predicated region body
PF: predicated region fallthrough
CT: control target
= control target key end

     0   :  { %s1731_s0 = inlined_call_operand.hbm [shape: f32[2,16,256], index: 0, kind: input, shape index: {}]   ;;  %s1732_s1 = inlined_call_operand.vmem [shape: f32[2,2,256], index: 1, kind: input, shape index: {}]   ;;  %s1733_s2 = inlined_call_operand.hbm [shape: f32[2,8,256], index: 2, kind: input, shape index: {}]   ;;  %s1734_s3 = inlined_call_operand.vmem [shape: f32[2,16], index: 3, kind: input, shape index: {}]   ;;  %s1735_s4 = inlined_call_operand.vmem [shape: f32[16,8], index: 4, kind: input, shape index: {}]   ;;  %s1736_s5 = inlined_call_operand.<no memory space> [shape: f32[1,1], index: 5, kind: input, shape index: {}]   ;;  %s1737_s6 = inlined_call_operand.hbm [shape: f32[2,16,256], index: 6, kind: output, shape index: {}]  }
   0x1   :  { %1747 = sst [smem:[#allocation22_spill]] %s1731_s0 }
   0x2   :  { %1748 = sst [smem:[#allocation23_spill]] %s1732_s1 }
   0x3   :  { %1749 = sst [smem:[#allocation24_spill]] %s1734_s3 }
   0x4   :  { %1750 = sst [smem:[#allocation25_spill]] %s1735_s4 }
   0x5   :  { %1751 = sst [smem:[#allocation26_spill]] %s1737_s6 }
   0x6   :  { %11 = sst [smem:[#allocation6]] %s1736_s5 }
   0x7   :  { %12 = vsyncpa [#allocation8], 0 }
   0x8   :  { %14 = vsyncpa [#allocation8 + $0x1], 0 }
   0x9   :  { %15 = vsyncpa [#allocation11], 0 }
   0xa   :  { %17 = vsyncpa [#allocation11 + $0x1], 0 }
   0xb   :  { %18 = vsyncpa [#allocation9], 0 }
   0xc   :  { %20 = vsyncpa [#allocation9 + $0x1], 0  ;;  %s1373_s23 = smov 0   ;;  %s1375_s24 = smov 0  }
   0xd   :  { %s1377_s25 = smov 0   ;;  %s1379_s26 = smov 0  }
   0xe   :  { %s1381_s27 = smov 0   ;;  %s1383_s28 = smov 0  }
   0xf   :  { %s1385_s29 = smov 0   ;;  %s1387_s5 = smov 0  }
  0x10   :  { %s1389_s30 = smov 0   ;;  %s1391_s7 = smov 0  }
  0x11   :  { %s1393_s8 = smov 0   ;;  %s1395_s9 = smov 0  }
  0x12   :  { %s1397_s10 = smov 0  }
  0x13 LB: > { %1752 = sst [smem:[#allocation16_spill]] %s1305_s5  ;;  %p61_p0 = scmp.ne.s32.totalorder %s1297_s28, %s1293_s27  ;;  %s1325_s10 = sphi %s1397_s10, %s26_s10   ;;  %s1321_s9 = sphi %s1395_s9, %s1789_s9   ;;  %s1317_s8 = sphi %s1393_s8, %s1788_s8   ;;  %s1313_s7 = sphi %s1391_s7, %s1787_s7   ;;  %s1309_s30 = sphi %s1389_s30, %s1786_s30   ;;  %s1305_s5 = sphi %s1387_s5, %s1785_s5   ;;  %s1301_s29 = sphi %s1385_s29, %s1784_s29   ;;  %s1297_s28 = sphi %s1383_s28, %s1783_s28   ;;  %s1293_s27 = sphi %s1381_s27, %s1782_s27   ;;  %s1289_s26 = sphi %s1379_s26, %s1781_s26   ;;  %s1285_s25 = sphi %s1377_s25, %s1780_s25   ;;  %s1281_s24 = sphi %s1375_s24, %s1779_s24   ;;  %s1277_s23 = sphi %s1373_s23, %s1778_s23  }
  0x14   : > { %1753 = sst [smem:[#allocation17_spill]] %s1317_s8  ;;  %p62_p1 = scmp.eq.s32.totalorder %s1325_s10, 0 }
  0x15   : > { %p1741_p2 = scmp.lt.s32.totalorder %s1325_s10, 8  ;;  %s247_s11 = sand.u32 1, %s1297_s28  }
  0x16   : > { %p63_p3 = por %p62_p1, %p61_p0  ;;  %s913_s12 = sshll.u32 %s247_s11, 4 }
  0x17   : > { %s914_s13 = sshll.u32 %s1321_s9, 2  ;;  %s251_s15 = scalar_lea.vmem [#allocation7], %s913_s12 }
  0x18   : > { %s255_s14 = sadd.s32 %s1317_s8, %s914_s13  ;;  %s260_s16 = sshll.u32 %s251_s15, 4  ;;  %s261_s16 = int_to_ptr.vmem [resolvable:$true] %s260_s16 }
  0x19   : > { %s915_s17 = sshll.u32 %s255_s14, 3  ;;  %s1754_s0 = sld [smem:[#allocation22_spill]] }
  0x1a   : > { %p962_p4 = pnand %p1741_p2, %p63_p3  ;;  %s248_s22 = scalar_lea.sflag [#allocation8], %s247_s11 }
  0x1b   : > { %s1327_s12 = smov 256   ;;  %s1328_s13 = smov 128  }
  0x1c   : > { %s1329_s14 = smov 8   ;;  %p919_p5 = scmp.ge.s32.totalorder %s1325_s10, 1 }
  0x1d   : > { %p300_p6 = scmp.lt.s32.totalorder %s1325_s10, 9  ;;  %s910_s11 = sadd.s32 4294967294, %s1325_s10  }
  0x1e   : > { %s38_s18 = sadd.s32 1, %s1313_s7  ;;  %s41_s19 = sadd.s32 1, %s1317_s8 }
  0x1f   : > { %s257_s20 = scalar_lea.hbm %s1754_s0, %s915_s17  ;;  %p1457_p7 = pnand %p919_p5, %p300_p6 }
  0x20   : > { %s258_s21 = sshll.u32 %s257_s20, 4  ;;  %s909_s17 = sadd.s32 4294967295, %s1325_s10   ;;  %s259_s21 = int_to_ptr.hbm [resolvable:$true] %s258_s21 }
  0x21   : > { %964 = dma.hbm_to_vmem [thread:$0]  (!%p962_p4), %s259_s21, 256, %s261_s16, %s248_s22, %s1327_s12, %s1328_s13, %s1329_s14  }
  0x22   : > { %p39_p8 = scmp.ge.s32.totalorder %s38_s18, 2  ;;  %s45_s16 = sadd.s32 1, %s1321_s9 }
  0x23   : > { %s54_s20 = sadd.s32 1, %s1297_s28  ;;  %p67_p9 = scmp.ne.s32.totalorder %s1293_s27, %s1289_s26 }
  0x24   : > { %s1791_s18 = smov (%p39_p8, %s38_s18), 0  ;;  %s1793_s19 = smov (!%p39_p8, %s41_s19), %s1317_s8 }
  0x25   : > { %1756 = sst [smem:[#allocation18_spill]] %s1791_s18  ;;  %p1472_p10 = scmp.eq.s32.totalorder %s909_s17, 0 }
  0x26   : > { %p43_p11 = scmp.ge.s32.totalorder %s1793_s19, 2  ;;  %s106_s22 = ssub.s32 %s1313_s7, %s1791_s18 }
  0x27   : > { %p1483_p12 = por %p1472_p10, %p67_p9  ;;  %s110_s13 = sadd.s32 1, %s1285_s25 }
  0x28   : > { %s1795_s19 = smov (%p43_p11, %s1793_s19), 0  ;;  %s1797_s16 = smov (!%p43_p11, %s45_s16), %s1321_s9 }
  0x29   : > { %1759 = sst [smem:[#allocation19_spill]] %s1795_s19  ;;  %s50_s14 = ssub.s32 %s1317_s8, %s1795_s19 }
  0x2a   : > { %p117_p13 = scmp.ne.s32.totalorder %s1285_s25, %s1281_s24  ;;  %p47_p3 = scmp.ge.s32.totalorder %s1797_s16, 2 }
  0x2b   : > { %p123_p4 = scmp.ne.s32.totalorder %s1281_s24, %s1277_s23  ;;  %p212_p6 = scmp.eq.s32.totalorder %s909_s17, 7 }
  0x2c   : > { %p1499_p5 = por %p117_p13, %p62_p1  ;;  %s1799_s16 = smov (%p47_p3, %s1797_s16), 0 }
  0x2d   : > { %1761 = sst [smem:[#allocation20_spill]] %s1799_s16  ;;  %p1507_p8 = por %p123_p4, %p1472_p10 }
  0x2e   : > { %p1514_p11 = por %p212_p6, %p61_p0  ;;  %s49_s23 = ssub.s32 %s1321_s9, %s1799_s16 }
  0x2f   : > { %p218_p1 = scmp.eq.s32.totalorder %s910_s11, 7  ;;  %s51_s8 = sor.u32 %s50_s14, %s49_s23 }
  0x30   : > { %s1763_s18 = scalar_select %p1514_p11, 1, 0 }
  0x31   : > { %s107_s17 = sor.u32 %s106_s22, %s49_s23  ;;  %p52_p13 = scmp.eq.s32.totalorder %s51_s8, 0 }
  0x32   : > { %1764 = sst [smem:[#allocation21_spill]] %s1763_s18  ;;  %p108_p3 = scmp.eq.s32.totalorder %s107_s17, 0 }
  0x33   : > { %p1523_p2 = por %p218_p1, %p67_p9  ;;  %s281_s6 = sand.u32 1, %s1285_s25  }
  0x34   : > { %s1529_s5 = scalar_select %p52_p13, %s1297_s28, %s54_s20  }
  0x35   : > { %s1532_s4 = scalar_select %p108_p3, %s1285_s25, %s110_s13  }
  0x36   : > { %s916_s3 = sshll.u32 %s281_s6, 3  ;;  %s917_s18 = sshll.u32 %s1321_s9, 1 }
  0x37   : > { %s289_s16 = sadd.s32 %s1313_s7, %s917_s18  ;;  %s285_s11 = scalar_lea.vmem [#allocation10], %s916_s3 }
  0x38   : > { %s295_s14 = sshll.u32 %s285_s11, 4  ;;  %s918_s1 = sshll.u32 %s289_s16, 3  ;;  %s296_s14 = int_to_ptr.vmem [resolvable:$true] %s295_s14 }
  0x39   : > { %s291_s23 = scalar_lea.hbm %s1733_s2, %s918_s1  ;;  %p1766_p0 = scmp.lt.s32.totalorder %s1325_s10, 8 }
  0x3a   : > { %s293_s17 = sshll.u32 %s291_s23, 4  ;;  %s282_s20 = scalar_lea.sflag [#allocation11], %s281_s6  ;;  %s294_s17 = int_to_ptr.hbm [resolvable:$true] %s293_s17 }
  0x3b   : > { %p965_p9 = pnand %p1766_p0, %p1499_p5  ;;  %304 = sbr.rel (%p1457_p7) target bundleno = 1001 (0x3e9), region = 44 }
  0x3c   : > { %s1546_s3 = sand.u32 (!%p1457_p7), 1, %s1293_s27  }
  0x3d   : > { %967 = dma.hbm_to_vmem [thread:$0]  (!%p965_p9), %s294_s17, 128, %s296_s14, %s282_s20  }
  0x3e   : > { %s920_s18 = sshll.u32 (!%p1457_p7), %s1546_s3, 4  ;;  %s307_s16 = scalar_lea.sflag (!%p1457_p7), [#allocation8], %s1546_s3 }
  0x3f   : > { %s1550_s13 = scalar_lea.vmem (!%p1457_p7), [#allocation7], %s920_s18 }
  0x40   : > { %1264 = dma.done.wait (%p1483_p12), %s307_s16, 256  }
  0x41   : > { %1266 = vsyncadd (%p1483_p12), %s307_s16, 4294967040  ;;  %s316_s0 = sand.u32 1, %s1281_s24  }
  0x42   : > { %s1557_s1 = sshll.u32 %s316_s0, 3  ;;  %s317_s6 = scalar_lea.sflag [#allocation11], %s316_s0 }
  0x43   : > { %s320_s15 = scalar_lea.vmem [#allocation10], %s1557_s1 }
  0x44   : > { %1268 = dma.done.wait (%p1507_p8), %s317_s6, 128  }
  0x45   : > { %1270 = vsyncadd (%p1507_p8), %s317_s6, 4294967168  ;;  %p363_p7 = scmp.lt.s32.totalorder %s1309_s30, 1  ;;  %p365_p10 = scmp.lt.s32.totalorder %s1301_s29, 1 }
  0x46   : > { %s1767_s20 = sld [smem:[#allocation23_spill]]  ;;  %s1571_s0 = scalar_lea.vmem [#allocation12], %s920_s18 }
  0x47   : > { %s364_s12 = scalar_select %p363_p7, %s1309_s30, 1 }
  0x48   : > { %s366_s11 = scalar_select %p365_p10, %s1301_s29, 1 }
  0x49   : > { %s923_s14 = sshll.u32 %s364_s12, 1  ;;  %p925_p12 = scmp.ne.s32.totalorder %s1301_s29, 0 }
  0x4a   : > { %s368_s22 = sadd.s32 %s923_s14, %s366_s11  ;;  %s1768_s12 = sld [smem:[#allocation24_spill]] (!%p925_p12) }
  0x4b   : > { %s924_s8 = sshll.u32 %s368_s22, 1  ;;  %374 = sbr.rel (%p925_p12) target bundleno = 211 (0xd3), region = 56 }
  0x4c   : > { %s370_s16 = scalar_lea.vmem %s1767_s20, %s924_s8 }
  0x50   : > { %v380_v0 = vld [vmem:[%s1550_s13 + $0x8] sm:$0xff]  ;;  %v379_v1 = vld [vmem:[%s1550_s13] sm:$0xff]  ;;  %v1330_v2 = vmov -1e+30   ;;  %vm381_vm0 = vcmask 130048   ;;  %v1331_v4 = vmov 0.0  }
  0x51   : > { %375 = vst [vmem:[#allocation4] sm:$0x1] %v1330_v2  ;;  %399 = vmatpush.msra.mxu0 %v380_v0  ;;  %v378_v3 = vld [vmem:[%s1768_s12] sm:$0x3] }
  0x52   : > { %376 = vst [vmem:[#allocation5] sm:$0x1] %v1331_v4 }
  0x53   : > { %377 = vst [vmem:[#allocation3] sm:$0xff] %v1331_v4  ;;  %400 = vmatpush.msra.mxu0 %v379_v1 }
  0x54   : > { %926 = vmatmul.msk.f32.vlgmr.msra.gmra.mxu0 %vm381_vm0, %v378_v3 }
  0xd1   : > { %v402_v5 = vpop.f32.mrf.mxu0 }
  0xd2   : > { %405 = vst [vmem:[#allocation2] sm:$0x3] %v402_v5 }
  0xd3 PF: > { %v406_v6 = vld [vmem:[%s370_s16] sm:$0x3]  ;;  %vm490_vm1 = vcmask 1041408   ;;  %vm441_vm2 = vcmask 15360   ;;  %v1622_v60 = vld [vmem:[#allocation4] sm:$0x1] }
  0xd4   : > { %409 = vxpose.xlu0.b32.start.end [1/1] (short) %v406_v6, 128  ;;  %p944_p4 = scmp.ne.s32.totalorder %s1301_s29, 1 }
  0xd5   : > { %s1769_s1 = sld [smem:[#allocation25_spill]] (!%p944_p4) }
  0xd6   : > { %s745_s14 = sld [smem:[#allocation6]] (!%p944_p4) }
  0xd9   : > { %v408_v7 = vld [vmem:[#allocation2] sm:$0x3] }
  0xda   : > { %927 = vmatpush.msk.msra.mxu0 %vm490_vm1, %v408_v7  ;;  %952 = vmatpush.msk.msra.mxu2 %vm490_vm1, %v408_v7 }
  0xdb   : > { %953 = vmatpush.msk.msra.mxu3 %vm490_vm1, %v408_v7 }
 0x178   : > { %v425_v8 = vpop.trf.xlu0 }
 0x179   : > { %928 = vmatmul.msk.f32.vlgmr.msra.gmra.mxu0 %vm441_vm2, %v425_v8 }
 0x180   : > { %v426_v9 = vpop.trf.xlu0 }
 0x181   : > { %929 = vmatmul.msk.f32.gmra.mxu0 %vm441_vm2, %v426_v9 }
 0x188   : > { %v427_v10 = vpop.trf.xlu0 }
 0x189   : > { %930 = vmatmul.msk.f32.gmra.mxu0 %vm441_vm2, %v427_v10 }
 0x190   : > { %v428_v11 = vpop.trf.xlu0 }
 0x191   : > { %931 = vmatmul.msk.f32.gmra.mxu0 %vm441_vm2, %v428_v11 }
 0x198   : > { %v429_v12 = vpop.trf.xlu0 }
 0x199   : > { %932 = vmatmul.msk.f32.gmra.mxu0 %vm441_vm2, %v429_v12 }
 0x1a0   : > { %v430_v13 = vpop.trf.xlu0 }
 0x1a1   : > { %933 = vmatmul.msk.f32.gmra.mxu0 %vm441_vm2, %v430_v13 }
 0x1a8   : > { %v431_v14 = vpop.trf.xlu0 }
 0x1a9   : > { %934 = vmatmul.msk.f32.vlgmr.msra.gmra.mxu2 %vm441_vm2, %v431_v14 }
 0x1b0   : > { %v432_v15 = vpop.trf.xlu0 }
 0x1b1   : > { %935 = vmatmul.msk.f32.gmra.mxu2 %vm441_vm2, %v432_v15 }
 0x1b8   : > { %v433_v16 = vpop.trf.xlu0 }
 0x1b9   : > { %936 = vmatmul.msk.f32.gmra.mxu2 %vm441_vm2, %v433_v16 }
 0x1c0   : > { %v434_v17 = vpop.trf.xlu0 }
 0x1c1   : > { %937 = vmatmul.msk.f32.gmra.mxu2 %vm441_vm2, %v434_v17 }
 0x1c8   : > { %v435_v18 = vpop.trf.xlu0 }
 0x1c9   : > { %938 = vmatmul.msk.f32.gmra.mxu2 %vm441_vm2, %v435_v18 }
 0x1d0   : > { %v436_v19 = vpop.trf.xlu0 }
 0x1d1   : > { %939 = vmatmul.msk.f32.gmra.mxu2 %vm441_vm2, %v436_v19 }
 0x1d8   : > { %v437_v20 = vpop.trf.xlu0 }
 0x1d9   : > { %940 = vmatmul.msk.f32.vlgmr.msra.gmra.mxu3 %vm441_vm2, %v437_v20 }
 0x1e0   : > { %v438_v21 = vpop.trf.xlu0 }
 0x1e1   : > { %941 = vmatmul.msk.f32.gmra.mxu3 %vm441_vm2, %v438_v21 }
 0x1e8   : > { %v439_v22 = vpop.trf.xlu0 }
 0x1e9   : > { %942 = vmatmul.msk.f32.gmra.mxu3 %vm441_vm2, %v439_v22 }
 0x1f0   : > { %v440_v23 = vpop.trf.xlu0 }
 0x1f1   : > { %943 = vmatmul.msk.f32.gmra.mxu3 %vm441_vm2, %v440_v23 }
 0x1f6   : > { %v1595_v24 = vpop.f32.mrf.mxu0 }
 0x1fe   : > { %v1599_v26 = vpop.f32.mrf.mxu0 }
 0x206   : > { %v1603_v28 = vpop.f32.mrf.mxu0 }
 0x20e   : > { %v1607_v30 = vpop.f32.mrf.mxu0 }
 0x216   : > { %v1609_v33 = vpop.f32.mrf.mxu0 }
 0x217   : > { %v560_v40 = vmax.f32 %v1595_v24, %v1609_v33 }
 0x21e   : > { %v1611_v36 = vpop.f32.mrf.mxu0 }
 0x21f   : > { %v561_v38 = vmax.f32 %v1599_v26, %v1611_v36 }
 0x22c   : > { %v1597_v25 = vpop.f32.mrf.mxu2 }
 0x22d   : > { %v562_v41 = vmax.f32 %v1603_v28, %v1597_v25 }
 0x234   : > { %v1601_v27 = vpop.f32.mrf.mxu2 }
 0x235   : > { %v563_v42 = vmax.f32 %v1607_v30, %v1601_v27 }
 0x23c   : > { %v1605_v29 = vpop.f32.mrf.mxu2 }
 0x23d   : > { %v564_v44 = vmax.f32 %v560_v40, %v1605_v29 }
 0x244   : > { %v538_v31 = vpop.f32.mrf.mxu2 }
 0x245   : > { %v565_v43 = vmax.f32 %v561_v38, %v538_v31 }
 0x24c   : > { %v541_v35 = vpop.f32.mrf.mxu2 }
 0x24d   : > { %v566_v45 = vmax.f32 %v562_v41, %v541_v35 }
 0x254   : > { %v544_v39 = vpop.f32.mrf.mxu2 }
 0x255   : > { %v567_v46 = vmax.f32 %v563_v42, %v544_v39 }
 0x25c   : > { %v547_v32 = vpop.f32.mrf.mxu3 }
 0x25d   : > { %v568_v49 = vmax.f32 %v564_v44, %v547_v32 }
 0x264   : > { %v550_v34 = vpop.f32.mrf.mxu3 }
 0x265   : > { %v569_v47 = vmax.f32 %v565_v43, %v550_v34 }
 0x267   : > { %v572_v52 = vmax.f32 %v568_v49, %v569_v47 }
 0x26c   : > { %v553_v37 = vpop.f32.mrf.mxu3 }
 0x26d   : > { %v570_v50 = vmax.f32 %v566_v45, %v553_v37 }
 0x274   : > { %v556_v48 = vpop.f32.mrf.mxu3 }
 0x275   : > { %v571_v51 = vmax.f32 %v567_v46, %v556_v48 }
 0x277   : > { %v573_v53 = vmax.f32 %v570_v50, %v571_v51 }
 0x279   : > { %v574_v54 = vmax.f32 %v572_v52, %v573_v53 }
 0x27b   : > { %v575_v55 = vrot.slane %v574_v54, 4 }
 0x27d   : > { %v576_v56 = vmax.f32 %v574_v54, %v575_v55  ;;  %v407_v55 = vld [vmem:[%s320_s15] sm:$0xff] }
 0x27f   : > { %v577_v57 = vrot.slane %v576_v56, 2 }
 0x281   : > { %v578_v58 = vmax.f32 %v576_v56, %v577_v57 }
 0x283   : > { %v579_v59 = vrot.slane %v578_v58, 1 }
 0x285   : > { %v580_v61 = vmax.f32 %v578_v58, %v579_v59 }
 0x287   : > { %v1625_v62 = vmax.f32 %v1622_v60, %v580_v61 }
 0x289   : > { %v586_v63 = vperm.slane %v1625_v62, 0  ;;  %688 = vst [vmem:[#allocation4] sm:$0x1] %v1625_v62 }
 0x28b   : > { %v603_v0 = vsub.f32 %v556_v48, %v586_v63  ;;  %v602_v1 = vsub.f32 %v553_v37, %v586_v63  ;;  %v601_v2 = vsub.f32 %v550_v34, %v586_v63  ;;  %v600_v5 = vsub.f32 %v547_v32, %v586_v63 }
 0x28c   : > { %v599_v7 = vsub.f32 %v544_v39, %v586_v63  ;;  %v598_v9 = vsub.f32 %v541_v35, %v586_v63  ;;  %v597_v11 = vsub.f32 %v538_v31, %v586_v63  ;;  %v596_v12 = vsub.f32 %v1605_v29, %v586_v63 }
 0x28d   : > { %v634_v3 = vmul.f32 1.442695, %v603_v0  ;;  %v632_v4 = vmul.f32 1.442695, %v602_v1  ;;  %v630_v6 = vmul.f32 1.442695, %v601_v2  ;;  %v589_v15 = vsub.f32 %v1599_v26, %v586_v63 }
 0x28e   : > { %v628_v8 = vmul.f32 1.442695, %v600_v5  ;;  %v626_v10 = vmul.f32 1.442695, %v599_v7  ;;  %v624_v14 = vmul.f32 1.442695, %v598_v9  ;;  %v588_v16 = vsub.f32 %v1595_v24, %v586_v63 }
 0x28f   : > { %1087 = vpow2.f32 %v634_v3  ;;  %v622_v18 = vmul.f32 1.442695, %v597_v11  ;;  %v595_v19 = vsub.f32 %v1601_v27, %v586_v63  ;;  %v620_v20 = vmul.f32 1.442695, %v596_v12  ;;  %v636_v9 = vld [vmem:[#allocation5] sm:$0x1] }
 0x290   : > { %1089 = vpow2.f32 %v632_v4  ;;  %v590_v21 = vsub.f32 %v1603_v28, %v586_v63  ;;  %v594_v23 = vsub.f32 %v1597_v25, %v586_v63  ;;  %v606_v26 = vmul.f32 1.442695, %v589_v15 }
 0x291   : > { %1091 = vpow2.f32 %v630_v6  ;;  %v591_v24 = vsub.f32 %v1607_v30, %v586_v63  ;;  %v604_v29 = vmul.f32 1.442695, %v588_v16  ;;  %v618_v32 = vmul.f32 1.442695, %v595_v19 }
 0x292   : > { %1093 = vpow2.f32 %v628_v8  ;;  %v593_v27 = vsub.f32 %v1611_v36, %v586_v63  ;;  %v592_v28 = vsub.f32 %v1609_v33, %v586_v63  ;;  %v608_v34 = vmul.f32 1.442695, %v590_v21 }
 0x293   : > { %1095 = vpow2.f32 %v626_v10  ;;  %v616_v37 = vmul.f32 1.442695, %v594_v23  ;;  %v610_v25 = vmul.f32 1.442695, %v591_v24  ;;  %v582_v63 = vsub.f32 %v1622_v60, %v1625_v62  ;;  %v661_v62 = vld [vmem:[#allocation3] sm:$0xff] }
 0x294   : > { %1097 = vpow2.f32 %v624_v14  ;;  %v614_v30 = vmul.f32 1.442695, %v593_v27  ;;  %v612_v39 = vmul.f32 1.442695, %v592_v28 }
 0x295   : > { %v1630_v13 = vpop.eup %1087  ;;  %1099 = vpow2.f32 %v622_v18  ;;  %v583_v2 = vmul.f32 1.442695, %v582_v63 }
 0x296   : > { %666 = vmatpush.msra.mxu1 %v1630_v13  ;;  %v1635_v17 = vpop.eup %1089  ;;  %1101 = vpow2.f32 %v620_v20 }
 0x297   : > { %v1640_v22 = vpop.eup %1091  ;;  %1103 = vpow2.f32 %v606_v26 }
 0x298   : > { %667 = vmatpush.msra.mxu1 %v1635_v17  ;;  %v1094_v31 = vpop.eup %1093  ;;  %1105 = vpow2.f32 %v604_v29 }
 0x299   : > { %v1096_v35 = vpop.eup %1095  ;;  %1107 = vpow2.f32 %v618_v32 }
 0x29a   : > { %668 = vmatpush.msra.mxu1 %v1640_v22  ;;  %v1098_v38 = vpop.eup %1097  ;;  %1109 = vpow2.f32 %v608_v34 }
 0x29b   : > { %v1100_v40 = vpop.eup %1099  ;;  %1111 = vpow2.f32 %v616_v37 }
 0x29c   : > { %669 = vmatpush.msra.mxu1 %v1094_v31  ;;  %v1102_v36 = vpop.eup %1101  ;;  %1113 = vpow2.f32 %v610_v25 }
 0x29d   : > { %v1104_v41 = vpop.eup %1103  ;;  %1115 = vpow2.f32 %v614_v30 }
 0x29e   : > { %670 = vmatpush.msra.mxu1 %v1096_v35  ;;  %v1106_v33 = vpop.eup %1105  ;;  %1117 = vpow2.f32 %v612_v39 }
 0x29f   : > { %v1108_v42 = vpop.eup %1107  ;;  %v638_v43 = vadd.f32 %v1106_v33, %v1104_v41  ;;  %1119 = vpow2.f32 %v583_v2 }
 0x2a0   : > { %671 = vmatpush.msra.mxu1 %v1098_v38  ;;  %v1110_v44 = vpop.eup %1109 }
 0x2a1   : > { %v1112_v45 = vpop.eup %1111  ;;  %v639_v46 = vadd.f32 %v1110_v44, %v638_v43 }
 0x2a2   : > { %672 = vmatpush.msra.mxu1 %v1100_v40  ;;  %v1114_v47 = vpop.eup %1113 }
 0x2a3   : > { %v1116_v48 = vpop.eup %1115  ;;  %v640_v49 = vadd.f32 %v1114_v47, %v639_v46 }
 0x2a4   : > { %673 = vmatpush.msra.mxu1 %v1102_v36  ;;  %v1118_v50 = vpop.eup %1117 }
 0x2a5   : > { %v641_v51 = vadd.f32 %v1118_v50, %v640_v49  ;;  %v1120_v8 = vpop.eup %1119 }
 0x2a6   : > { %674 = vmatpush.msra.mxu1 %v1108_v42  ;;  %v637_v12 = vmul.f32 %v1120_v8, %v636_v9  ;;  %v663_v60 = vperm.slane %v1120_v8, 0 }
 0x2a7   : > { %v642_v52 = vadd.f32 %v1116_v48, %v641_v51 }
 0x2a8   : > { %675 = vmatpush.msra.mxu1 %v1112_v45  ;;  %v665_v15 = vmul.f32 %v663_v60, %v661_v62 }
 0x2a9   : > { %v643_v53 = vadd.f32 %v1112_v45, %v642_v52 }
 0x2aa   : > { %676 = vmatpush.msra.mxu1 %v1116_v48 }
 0x2ab   : > { %v644_v54 = vadd.f32 %v1108_v42, %v643_v53 }
 0x2ac   : > { %677 = vmatpush.msra.mxu1 %v1118_v50 }
 0x2ad   : > { %v645_v56 = vadd.f32 %v1102_v36, %v644_v54 }
 0x2ae   : > { %678 = vmatpush.msra.mxu1 %v1114_v47 }
 0x2af   : > { %v646_v57 = vadd.f32 %v1100_v40, %v645_v56 }
 0x2b0   : > { %679 = vmatpush.msra.mxu1 %v1110_v44 }
 0x2b1   : > { %v647_v58 = vadd.f32 %v1098_v38, %v646_v57 }
 0x2b2   : > { %680 = vmatpush.msra.mxu1 %v1104_v41 }
 0x2b3   : > { %v648_v59 = vadd.f32 %v1096_v35, %v647_v58 }
 0x2b4   : > { %681 = vmatpush.msra.mxu1 %v1106_v33 }
 0x2b5   : > { %682 = vmatmul.f32.vlgmr.msra.gmra.mxu1 %v407_v55  ;;  %v649_v61 = vadd.f32 %v1094_v31, %v648_v59 }
 0x2b7   : > { %v650_v0 = vadd.f32 %v1640_v22, %v649_v61 }
 0x2b9   : > { %v651_v1 = vadd.f32 %v1635_v17, %v650_v0 }
 0x2bb   : > { %v652_v3 = vadd.f32 %v1630_v13, %v651_v1 }
 0x2bd   : > { %v653_v4 = vrot.slane %v652_v3, 4 }
 0x2bf   : > { %v654_v5 = vadd.f32 %v653_v4, %v652_v3 }
 0x2c1   : > { %v655_v6 = vrot.slane %v654_v5, 2 }
 0x2c3   : > { %v656_v7 = vadd.f32 %v655_v6, %v654_v5 }
 0x2c5   : > { %v657_v10 = vrot.slane %v656_v7, 1 }
 0x2c7   : > { %v658_v11 = vadd.f32 %v657_v10, %v656_v7 }
 0x2c9   : > { %v659_v14 = vadd.f32 %v658_v11, %v637_v12 }
 0x2cb   : > { %660 = vst [vmem:[#allocation5] sm:$0x1] %v659_v14 }
 0x331   : > { %692 = sbr.rel (%p944_p4) target bundleno = 977 (0x3d1), region = 60 }
 0x332   : > { %v683_v16 = vpop.f32.mrf.mxu1 }
 0x333   : > { %v686_v17 = vadd.f32 %v683_v16, %v665_v15 }
 0x335   : > { %687 = vst [vmem:[#allocation3] sm:$0xff] %v686_v17 }
 0x336   : > { %v694_v13 = vld [vmem:[#allocation5] sm:$0x1]  ;;  %v713_v34 = vld [vmem:[%s1769_s1] sm:$0xff]  ;;  %vm715_vm7 = vcmask 64512   ;;  %v746_v37 = vstv %s745_s14 }
 0x337   : > { %1121 = vrcp.f32 %v694_v13  ;;  %v706_v20 = vand.u32 2147483648, %v694_v13  ;;  %vm700_vm3 = vweird.f32 %v694_v13  ;;  %v704_v22 = vand.u32 2147483647, %v694_v13  ;;  %v714_v35 = vld [vmem:[%s1769_s1 + $0x8] sm:$0xff] }
 0x338   : > { %v749_v38 = vld [vmem:[%s1550_s13] sm:$0xff]  ;;  %v750_v39 = vld [vmem:[%s1550_s13 + $0x8] sm:$0xff] }
 0x339   : > { %v707_v26 = vor.u32 1.1754944e-38, %v706_v20  ;;  %vm705_vm6 = vcmp.eq.f32.partialorder %v704_v22, 8.507059e+37 }
 0x33c   : > { %v693_v31 = vld [vmem:[#allocation3] sm:$0xff] }
 0x33d   : > { %v1122_v18 = vpop.eup %1121 }
 0x33e   : > { %v696_v19 = vmul.f32 %v1122_v18, %v694_v13  ;;  %vm701_vm4 = vweird.f32 %v1122_v18 }
 0x33f   : > { %vm702_vm5 = vmor %vm700_vm3, %vm701_vm4 }
 0x340   : > { %v697_v21 = vsub.f32 1.0, %v696_v19 }
 0x342   : > { %v698_v23 = vmul.f32 %v1122_v18, %v697_v21 }
 0x344   : > { %v699_v24 = vadd.f32 %v1122_v18, %v698_v23 }
 0x346   : > { %v703_v29 = vsel %vm702_vm5, %v1122_v18, %v699_v24 }
 0x347   : > { %v708_v32 = vsel %vm705_vm6, %v707_v26, %v703_v29 }
 0x348   : > { %v710_v27 = vperm.slane %v708_v32, 0 }
 0x34a   : > { %v712_v28 = vmul.f32 %v710_v27, %v693_v31 }
 0x34c   : > { %737 = vmatpush.msra.mxu0 %v712_v28  ;;  %954 = vmatpush.msra.mxu1 %v712_v28 }
 0x34d   : > { %945 = vmatmul.msk.f32.vlgmr.msra.gmra.mxu0 %vm715_vm7, %v713_v34  ;;  %946 = vmatmul.msk.f32.vlgmr.msra.gmra.mxu1 %vm715_vm7, %v714_v35 }
 0x3ca   : > { %v739_v25 = vpop.f32.mrf.mxu0  ;;  %v742_v30 = vpop.f32.mrf.mxu1 }
 0x3cb   : > { %v747_v40 = vmul.f32 %v746_v37, %v739_v25  ;;  %v748_v36 = vmul.f32 %v746_v37, %v742_v30 }
 0x3cd   : > { %v751_v41 = vadd.f32 %v749_v38, %v747_v40  ;;  %v752_v33 = vadd.f32 %v750_v39, %v748_v36 }
 0x3cf   : > { %753 = vst [vmem:[%s1571_s0] sm:$0xff] %v751_v41 }
 0x3d0   : > { %754 = vst [vmem:[%s1571_s0 + $0x8] sm:$0xff] %v752_v33 }
 0x3d1 PF: > { %s1770_s22 = sld [smem:[#allocation16_spill]]  ;;  %s948_s23 = sshll.u32 %s1309_s30, 2 }
 0x3d2   : > { %s769_s20 = sshll.u32 %s1571_s0, 4  ;;  %s1772_s13 = sld [smem:[#allocation26_spill]]  ;;  %s770_s20 = int_to_ptr.vmem [resolvable:$true] %s769_s20 }
 0x3d3   : > { %s756_s18 = scalar_lea.sflag [#allocation9], %s1546_s3 }
 0x3d7   : > { %s766_s17 = sadd.s32 %s1770_s22, %s948_s23 }
 0x3d8   : > { %s949_s16 = sshll.u32 %s766_s17, 3  ;;  %s1203_s0 = scalar_lea.hbm %s1772_s13, 64 }
 0x3d9   : > { %s768_s12 = scalar_lea.hbm %s1772_s13, %s949_s16 }
 0x3da   : > { %s771_s29 = sshll.u32 %s768_s12, 4  ;;  %s772_s29 = int_to_ptr.hbm [resolvable:$true] %s771_s29 }
 0x3db   : > { %s1197_s15 = sshra.s32 %s772_s29, 4  ;;  %s1198_s15 = int_to_ptr.hbm [resolvable:$true] %s1197_s15 }
 0x3dc   : > { %s1199_s11 = scalar_lea.hbm %s1198_s15, 16  ;;  %p1204_p1 = scmp.lt.s32.totalorder %s1198_s15, %s1772_s13 }
 0x3dd   : > { %p1200_p5 = scmp.ne.s32.totalorder %s1198_s15, %s1199_s11  ;;  %p1205_p13 = scmp.lt.s32.totalorder %s1203_s0, %s1199_s11 }
 0x3df   : > { %p1201_p6 = pnand %p1200_p5, %p1514_p11  ;;  %p1206_p3 = por %p1205_p13, %p1204_p1 }
 0x3e1   : > { %p1202_p8 = pneg %p1201_p6 }
 0x3e3   : > { %p1207_p0 = pnand %p1206_p3, %p1202_p8 }
 0x3e5   : > { %1210 = shalt.err (!%p1207_p0)
}
 0x3e6   : > { %s1332_s3 = smov 128   ;;  %s1333_s17 = smov 256  }
 0x3e7   : > { %s1334_s16 = smov 8  }
 0x3e8   : > { %959 = dma.vmem_to_hbm [thread:$0]  (%p1514_p11), %s770_s20, 256, %s772_s29, %s756_s18, %s1332_s3, %s1333_s17, %s1334_s16  }
 0x3e9 PF: > { %p973_p9 = scmp.ge.s32.totalorder %s1325_s10, 2  ;;  %s786_s19 = sand.u32 1, %s1289_s26  }
 0x3ea   : > { %s787_s6 = scalar_lea.sflag [#allocation9], %s786_s19 }
 0x3eb   : > { %p969_p7 = pnand %p973_p9, %p1523_p2 }
 0x3ed   : > { %p970_p10 = pneg %p969_p7 }
 0x3ef   : > { %1272 = dma.done.wait (%p970_p10), %s787_s6, 256  }
 0x3f0   : > { %1274 = vsyncadd (%p970_p10), %s787_s6, 4294967040  ;;  %s26_s10 = sadd.s32 1, %s1325_s10   ;;  %s1774_s8 = sld [smem:[#allocation17_spill]] }
 0x3f1   : > { %p1687_p12 = scmp.ge.s32.totalorder %s26_s10, 10   ;;  %s1775_s21 = sld [smem:[#allocation18_spill]] }
 0x3f2   : > { %s1776_s20 = sld [smem:[#allocation19_spill]]  ;;  %s1778_s23 = smov %s1281_s24 }
 0x3f3   : > { %s1777_s18 = sld [smem:[#allocation20_spill]]  ;;  %s1779_s24 = smov %s1285_s25 }
 0x3f4   : > { %s1780_s25 = smov %s1532_s4  ;;  %s1781_s26 = smov %s1293_s27 }
 0x3f5   : > { %s1782_s27 = smov %s1297_s28  ;;  %s1783_s28 = smov %s1529_s5 }
 0x3f6   : > { %s1784_s29 = smov %s1313_s7  ;;  %s1785_s5 = smov %s1774_s8 }
 0x3f7   : > { %s1786_s30 = smov %s1321_s9  ;;  %s1787_s7 = smov %s1775_s21 }
 0x3f8   : > { %s1788_s8 = smov %s1776_s20  ;;  %25 = sbr.rel (!%p1687_p12) target bundleno = 19 (0x13), region = 113 }
 0x3f9   : > { %s1789_s9 = smov %s1777_s18 }
 0x3fd   :  { %793 = vsyncpa [#allocation8], 1 }
 0x3fe   :  { %795 = vsyncpa [#allocation8 + $0x1], 1 }
 0x3ff   :  { %796 = vsyncpa [#allocation11], 1 }
 0x400   :  { %798 = vsyncpa [#allocation11 + $0x1], 1 }
 0x401   :  { %799 = vsyncpa [#allocation9], 1 }
 0x402   :  { %801 = vsyncpa [#allocation9 + $0x1], 1 }

</bundles_post_ra>
